<compile_context>
chip_gen: v5e
topology: v5e:2x2
jax: 0.10.0
libtpu: 0.0.40
codegen_flags: <defaults>
</compile_context>

<pallas_src>
import jax
import jax.numpy as jnp
from jax.experimental import pallas as pl
from jax.experimental.pallas import tpu as pltpu

IMG_FEAT = 1000       # output dim of image_model (ImageNet-style head)
HIDDEN = 32           # text_model.config.hidden_size
PROJ = 256            # f_image / f_text / fc hidden dim
NUM_CLASSES = 18
OUT_PAD = 128         # lane-dense output width (sliced back to 18 outside)


def _round_up(x, m):
    return (x + m - 1) // m * m


# --------------------------------------------------------------------------
# Pallas kernel: fused JointModel head
#   h   = relu(img @ Wf_img + txt @ Wf_txt + b_fused)   (TILE_B, 256)
#   out = h @ W2_pad + b2_pad                           (TILE_B, 128)
# Activations arrive f32 and are cast to bf16 in-kernel; weights are bf16;
# accumulation is f32; fused bias / output bias / output are f32.
# --------------------------------------------------------------------------
def joint_head_kernel(img_ref, txt_ref,
                      wf_img_ref, wf_txt_ref, bf_ref,
                      w2_ref, b2_ref,
                      out_ref):
    img = img_ref[...].astype(jnp.bfloat16)               # (TILE_B, 1000)
    txt = txt_ref[...].astype(jnp.bfloat16)               # (TILE_B, 32)
    h = (jnp.dot(img, wf_img_ref[...],
                 preferred_element_type=jnp.float32)
         + jnp.dot(txt, wf_txt_ref[...],
                   preferred_element_type=jnp.float32)
         + bf_ref[...])
    h = jnp.maximum(h, 0.0)                                # ReLU
    out = jnp.dot(h.astype(jnp.bfloat16), w2_ref[...],
                  preferred_element_type=jnp.float32) + b2_ref[...]
    out_ref[...] = out


# --------------------------------------------------------------------------
# Offline weight fusion + padding. Called ONCE at init (hoisted out of the
# forward path).  Linear weights stored transposed as [in, out]; biases [1, out].
# Fold (exact, linear before the ReLU):
#   h_pre = img @ (Wimg@W1a) + txt @ (Wtxt@W1b) + (bimg@W1a + btxt@W1b + b1)
# Fold and fused bias stay in f32; only the final fused weights go to bf16.
# --------------------------------------------------------------------------
def fuse_and_pad_params(p):
    wf_img = p["w_img"] @ p["w1a"]                                     # (1000,256)
    wf_txt = p["w_txt"] @ p["w1b"]                                     # (32,  256)
    b_fused = p["b_img"] @ p["w1a"] + p["b_txt"] @ p["w1b"] + p["b1"]  # (1, 256)

    w2_p = jnp.zeros((PROJ, OUT_PAD), jnp.float32).at[:, :NUM_CLASSES].set(p["w2"])
    b2_p = jnp.zeros((1, OUT_PAD), jnp.float32).at[:, :NUM_CLASSES].set(p["b2"])

    return {
        "wf_img": wf_img.astype(jnp.bfloat16),   # (1000, 256) unpadded K
        "wf_txt": wf_txt.astype(jnp.bfloat16),   # (32,   256) unpadded K
        "bf": b_fused.astype(jnp.float32),       # (1, 256)
        "w2": w2_p.astype(jnp.bfloat16),         # (256, 128)
        "b2": b2_p.astype(jnp.float32),          # (1, 128)
    }


# --------------------------------------------------------------------------
# Wrapper: batch-only padding (no feature pad, no extra cast pass), 1-D batch
# grid, weights VMEM-resident across grid steps, slice back to (B, 18).
# --------------------------------------------------------------------------
def joint_head(img_feat, txt_cls, fused):
    B = img_feat.shape[0]
    b8 = _round_up(max(B, 1), 8)              # sublane granularity

    if b8 <= 8:
        tile_b = b8                           # tiny batch: single step
    else:
        # >=2 grid steps so both v7x TensorCores get work; up to 1024 rows
        # per step to amortize per-step overhead on v5e/v6e.
        tile_b = min(1024, _round_up(-(-b8 // 2), 8))
    b_pad = _round_up(b8, tile_b)

    if b_pad != B:                            # batch-dim pad only when needed
        img_feat = jnp.pad(img_feat, ((0, b_pad - B), (0, 0)))
        txt_cls = jnp.pad(txt_cls, ((0, b_pad - B), (0, 0)))

    grid = (b_pad // tile_b,)
    out_pad = pl.pallas_call(
        joint_head_kernel,
        out_shape=jax.ShapeDtypeStruct((b_pad, OUT_PAD), jnp.float32),
        grid_spec=pltpu.PrefetchScalarGridSpec(
            num_scalar_prefetch=0,
            grid=grid,
            in_specs=[
                # batch-tiled f32 activations, full (unpadded) feature width
                pl.BlockSpec((tile_b, IMG_FEAT), lambda i: (i, 0)),
                pl.BlockSpec((tile_b, HIDDEN), lambda i: (i, 0)),
                # weights / biases: same block every step -> VMEM-resident
                pl.BlockSpec((IMG_FEAT, PROJ), lambda i: (0, 0)),
                pl.BlockSpec((HIDDEN, PROJ), lambda i: (0, 0)),
                pl.BlockSpec((1, PROJ), lambda i: (0, 0)),
                pl.BlockSpec((PROJ, OUT_PAD), lambda i: (0, 0)),
                pl.BlockSpec((1, OUT_PAD), lambda i: (0, 0)),
            ],
            out_specs=pl.BlockSpec((tile_b, OUT_PAD), lambda i: (i, 0)),
        ),
        compiler_params=pltpu.CompilerParams(
            dimension_semantics=("parallel",),
            vmem_limit_bytes=32 * 1024 * 1024),
    )(img_feat, txt_cls,
      fused["wf_img"], fused["wf_txt"], fused["bf"],
      fused["w2"], fused["b2"])

    # padded rows (B..b_pad) contain relu(b_fused)@w2+b2 garbage — never
    # consume out_pad directly, always slice.
    return out_pad[:B, :NUM_CLASSES]


# --------------------------------------------------------------------------
# Deterministic parameter construction (synthetic, not a checkpoint load).
# --------------------------------------------------------------------------
def make_params(key):
    ks = jax.random.split(key, 8)

    def lin(kw, kb, fin, fout):
        bound = 1.0 / (fin ** 0.5)
        w = jax.random.uniform(kw, (fin, fout), jnp.float32, -bound, bound)
        b = jax.random.uniform(kb, (1, fout), jnp.float32, -bound, bound)
        return w, b

    w_img, b_img = lin(ks[0], ks[1], IMG_FEAT, PROJ)
    w_txt, b_txt = lin(ks[2], ks[3], HIDDEN, PROJ)
    w1, b1 = lin(ks[4], ks[5], 2 * PROJ, PROJ)
    w2, b2 = lin(ks[6], ks[7], PROJ, NUM_CLASSES)
    return {
        "w_img": w_img, "b_img": b_img,
        "w_txt": w_txt, "b_txt": b_txt,
        "w1a": w1[:PROJ], "w1b": w1[PROJ:], "b1": b1,
        "w2": w2, "b2": b2,
    }


# --------------------------------------------------------------------------
# Backbone stubs (plain-JAX glue). The real image_model / text_model are
# external pretrained networks and have no definition in this module.
# TODO(synk): external image_model / text_model backbones replaced by
#             deterministic linear / embedding stubs.
# --------------------------------------------------------------------------
def stub_image_model(image, w):
    # image: NCHW [B, C, H, W] -> flatten -> [B, 1000]
    B = image.shape[0]
    return image.reshape(B, -1) @ w


def stub_text_model(input_ids, attention_mask, emb_table):
    # last_hidden_state: [B, S, hidden] (attention_mask unused by the stub)
    del attention_mask
    return emb_table[input_ids]


def joint_model_forward(input_ids, attention_mask, image, fused, backbone):
    img_feature = stub_image_model(image, backbone["img_w"])          # [B, 1000]
    text_feature = stub_text_model(input_ids, attention_mask,
                                   backbone["emb"])                    # [B, S, H]
    return joint_head(img_feature, text_feature[:, 0, :], fused)      # [B, 18]


# Pure-JAX f32 reference for the head (correctness check, original structure).
def joint_head_ref(img_feat, txt_cls, p):
    x1 = img_feat @ p["w_img"] + p["b_img"]
    x2 = txt_cls @ p["w_txt"] + p["b_txt"]
    x = jnp.concatenate([x1, x2], axis=1)
    w1 = jnp.concatenate([p["w1a"], p["w1b"]], axis=0)
    h = jnp.maximum(x @ w1 + p["b1"], 0.0)
    return h @ p["w2"] + p["b2"]


if __name__ == "__main__":
    key = jax.random.PRNGKey(0)
    k_param, k_img, k_ids, k_bb1, k_bb2 = jax.random.split(key, 5)

    B, C, H, W = 2, 4, 16, 16
    S, VOCAB = 8, 100

    params = make_params(k_param)
    # Weight fusion + padding done ONCE at init (hoisted out of the forward).
    fused = jax.tree_util.tree_map(jax.block_until_ready,
                                   fuse_and_pad_params(params))

    backbone = {
        "img_w": jax.random.normal(k_bb1, (C * H * W, IMG_FEAT), jnp.float32) * 0.02,
        "emb": jax.random.normal(k_bb2, (VOCAB, HIDDEN), jnp.float32) * 0.02,
    }

    image = jax.random.normal(k_img, (B, C, H, W), jnp.float32)         # NCHW
    input_ids = jax.random.randint(k_ids, (B, S), 0, VOCAB)
    attention_mask = jnp.ones((B, S), jnp.int32)

    out = joint_model_forward(input_ids, attention_mask, image, fused, backbone)
    out = jax.block_until_ready(out)

    # correctness check of the Pallas head against a pure-JAX f32 reference
    # (bf16 MXU inputs + fused weights -> looser tolerance)
    img_feature = stub_image_model(image, backbone["img_w"])
    txt_cls = stub_text_model(input_ids, attention_mask, backbone["emb"])[:, 0, :]
    ref = joint_head_ref(img_feature, txt_cls, params)
    assert out.shape == (B, NUM_CLASSES)
    assert jnp.allclose(out, ref, atol=2e-2, rtol=2e-2), (
        f"max abs err {jnp.max(jnp.abs(out - ref))}")

    print("KERNEL_OK")
</pallas_src>

<mosaic_0001>
module attributes {stable_mosaic.version = 11 : i64} {
  func.func @joint_head_kernel(%arg0: i32, %arg1: memref<8x1000xf32, #tpu.memory_space<vmem>>, %arg2: memref<8x32xf32, #tpu.memory_space<vmem>>, %arg3: memref<1000x256xbf16, #tpu.memory_space<vmem>>, %arg4: memref<32x256xbf16, #tpu.memory_space<vmem>>, %arg5: memref<1x256xf32, #tpu.memory_space<vmem>>, %arg6: memref<256x128xbf16, #tpu.memory_space<vmem>>, %arg7: memref<1x128xf32, #tpu.memory_space<vmem>>, %arg8: memref<8x128xf32, #tpu.memory_space<vmem>>) attributes {dimension_semantics = [#tpu.dimension_semantics<parallel>], iteration_bounds = array<i64: 1>, scalar_prefetch = 0 : i64, scratch_operands = 0 : i64, tpu.core_type = #tpu.core_type<tc>, window_params = [{transform_indices = @transform_0, window_bounds = array<i64: 8, 1000>}, {transform_indices = @transform_1, window_bounds = array<i64: 8, 32>}, {pipeline_mode = #tpu.pipeline_mode<synchronous>, transform_indices = @transform_2, window_bounds = array<i64: 1000, 256>}, {pipeline_mode = #tpu.pipeline_mode<synchronous>, transform_indices = @transform_3, window_bounds = array<i64: 32, 256>}, {pipeline_mode = #tpu.pipeline_mode<synchronous>, transform_indices = @transform_4, window_bounds = array<i64: 1, 256>}, {pipeline_mode = #tpu.pipeline_mode<synchronous>, transform_indices = @transform_5, window_bounds = array<i64: 256, 128>}, {pipeline_mode = #tpu.pipeline_mode<synchronous>, transform_indices = @transform_6, window_bounds = array<i64: 1, 128>}, {transform_indices = @transform_7, window_bounds = array<i64: 8, 128>}]} {
    %c0 = arith.constant 0 : index
    %c0_0 = arith.constant 0 : index
    %0 = vector.load %arg1[%c0, %c0_0] : memref<8x1000xf32, #tpu.memory_space<vmem>>, vector<8x1000xf32>
    %1 = arith.truncf %0 : vector<8x1000xf32> to vector<8x1000xbf16>
    %c0_1 = arith.constant 0 : index
    %c0_2 = arith.constant 0 : index
    %2 = vector.load %arg2[%c0_1, %c0_2] : memref<8x32xf32, #tpu.memory_space<vmem>>, vector<8x32xf32>
    %3 = arith.truncf %2 : vector<8x32xf32> to vector<8x32xbf16>
    %c0_3 = arith.constant 0 : index
    %c0_4 = arith.constant 0 : index
    %4 = vector.load %arg3[%c0_3, %c0_4] : memref<1000x256xbf16, #tpu.memory_space<vmem>>, vector<1000x256xbf16>
    %cst = arith.constant dense<0.000000e+00> : vector<8x256xf32>
    %5 = tpu.matmul %1, %4, %cst {dimension_numbers = #tpu.dot_dimension_numbers<[1], [0], [0], [1], [0, 0, 1, 1], [], []>} : vector<8x1000xbf16>, vector<1000x256xbf16>, vector<8x256xf32> -> vector<8x256xf32>
    %c0_5 = arith.constant 0 : index
    %c0_6 = arith.constant 0 : index
    %6 = vector.load %arg4[%c0_5, %c0_6] : memref<32x256xbf16, #tpu.memory_space<vmem>>, vector<32x256xbf16>
    %cst_7 = arith.constant dense<0.000000e+00> : vector<8x256xf32>
    %7 = tpu.matmul %3, %6, %cst_7 {dimension_numbers = #tpu.dot_dimension_numbers<[1], [0], [0], [1], [0, 0, 1, 1], [], []>} : vector<8x32xbf16>, vector<32x256xbf16>, vector<8x256xf32> -> vector<8x256xf32>
    %8 = arith.addf %5, %7 : vector<8x256xf32>
    %c0_8 = arith.constant 0 : index
    %c0_9 = arith.constant 0 : index
    %9 = vector.load %arg5[%c0_8, %c0_9] : memref<1x256xf32, #tpu.memory_space<vmem>>, vector<1x256xf32>
    %10 = vector.broadcast %9 : vector<1x256xf32> to vector<8x256xf32>
    %11 = arith.addf %8, %10 : vector<8x256xf32>
    %cst_10 = arith.constant 0.000000e+00 : f32
    %12 = vector.broadcast %cst_10 : f32 to vector<8x256xf32>
    %13 = arith.maximumf %11, %12 : vector<8x256xf32>
    %14 = arith.truncf %13 : vector<8x256xf32> to vector<8x256xbf16>
    %c0_11 = arith.constant 0 : index
    %c0_12 = arith.constant 0 : index
    %15 = vector.load %arg6[%c0_11, %c0_12] : memref<256x128xbf16, #tpu.memory_space<vmem>>, vector<256x128xbf16>
    %cst_13 = arith.constant dense<0.000000e+00> : vector<8x128xf32>
    %16 = tpu.matmul %14, %15, %cst_13 {dimension_numbers = #tpu.dot_dimension_numbers<[1], [0], [0], [1], [0, 0, 1, 1], [], []>} : vector<8x256xbf16>, vector<256x128xbf16>, vector<8x128xf32> -> vector<8x128xf32>
    %c0_14 = arith.constant 0 : index
    %c0_15 = arith.constant 0 : index
    %17 = vector.load %arg7[%c0_14, %c0_15] : memref<1x128xf32, #tpu.memory_space<vmem>>, vector<1x128xf32>
    %18 = vector.broadcast %17 : vector<1x128xf32> to vector<8x128xf32>
    %19 = arith.addf %16, %18 : vector<8x128xf32>
    %c0_16 = arith.constant 0 : index
    %c0_17 = arith.constant 0 : index
    %20 = vector.load %arg8[%c0_16, %c0_17] : memref<8x128xf32, #tpu.memory_space<vmem>>, vector<8x128xf32>
    tpu.vector_store %arg8[%c0_16, %c0_17], %19 {strides = array<i32>} : memref<8x128xf32, #tpu.memory_space<vmem>>, vector<8x128xf32>,
    return
  }
  func.func @transform_0(%arg0: i32) -> (i32, i32) {
    %c0_i32 = arith.constant 0 : i32
    %c0_i32_0 = arith.constant 0 : i32
    return %arg0, %c0_i32 : i32, i32
  }
  func.func @transform_1(%arg0: i32) -> (i32, i32) {
    %c0_i32 = arith.constant 0 : i32
    %c0_i32_0 = arith.constant 0 : i32
    return %arg0, %c0_i32 : i32, i32
  }
  func.func @transform_2(%arg0: i32) -> (i32, i32) {
    %c0_i32 = arith.constant 0 : i32
    %c0_i32_0 = arith.constant 0 : i32
    %c0_i32_1 = arith.constant 0 : i32
    return %c0_i32, %c0_i32_0 : i32, i32
  }
  func.func @transform_3(%arg0: i32) -> (i32, i32) {
    %c0_i32 = arith.constant 0 : i32
    %c0_i32_0 = arith.constant 0 : i32
    %c0_i32_1 = arith.constant 0 : i32
    return %c0_i32, %c0_i32_0 : i32, i32
  }
  func.func @transform_4(%arg0: i32) -> (i32, i32) {
    %c0_i32 = arith.constant 0 : i32
    %c0_i32_0 = arith.constant 0 : i32
    %c0_i32_1 = arith.constant 0 : i32
    return %c0_i32, %c0_i32_0 : i32, i32
  }
  func.func @transform_5(%arg0: i32) -> (i32, i32) {
    %c0_i32 = arith.constant 0 : i32
    %c0_i32_0 = arith.constant 0 : i32
    %c0_i32_1 = arith.constant 0 : i32
    return %c0_i32, %c0_i32_0 : i32, i32
  }
  func.func @transform_6(%arg0: i32) -> (i32, i32) {
    %c0_i32 = arith.constant 0 : i32
    %c0_i32_0 = arith.constant 0 : i32
    %c0_i32_1 = arith.constant 0 : i32
    return %c0_i32, %c0_i32_0 : i32, i32
  }
  func.func @transform_7(%arg0: i32) -> (i32, i32) {
    %c0_i32 = arith.constant 0 : i32
    %c0_i32_0 = arith.constant 0 : i32
    return %arg0, %c0_i32 : i32, i32
  }
}

</mosaic_0001>

<bundles_post_ra>
// kernel: tpu_custom_call.1
= control target key start
LH: loop header
LB: loop body
LE: loop exit
PB: predicated region body
PF: predicated region fallthrough
CT: control target
= control target key end

     0   :  { %12 = vsyncpa [#allocation3], 0  ;;  %s2339_s0 = inlined_call_operand.hbm [shape: f32[8,1000], index: 0, kind: input, shape index: {}]   ;;  %s2340_s1 = inlined_call_operand.hbm [shape: f32[8,32], index: 1, kind: input, shape index: {}]   ;;  %s2341_s2 = inlined_call_operand.hbm [shape: bf16[1000,256], index: 2, kind: input, shape index: {}]   ;;  %s2342_s3 = inlined_call_operand.hbm [shape: bf16[32,256], index: 3, kind: input, shape index: {}]   ;;  %s2343_s4 = inlined_call_operand.vmem [shape: f32[1,256], index: 4, kind: input, shape index: {}]   ;;  %s2344_s5 = inlined_call_operand.hbm [shape: bf16[256,128], index: 5, kind: input, shape index: {}]   ;;  %s2345_s6 = inlined_call_operand.vmem [shape: f32[1,128], index: 6, kind: input, shape index: {}]   ;;  %s2346_s7 = inlined_call_operand.hbm [shape: f32[8,128], index: 7, kind: output, shape index: {}]  }
   0x1   :  { %13 = vsyncpa [#allocation6], 0 }
   0x2   :  { %14 = vsyncpa [#allocation9], 0  ;;  %s32_s26 = sshll.u32 %s2340_s1, 4  ;;  %s33_s26 = int_to_ptr.hbm [resolvable:$true] %s32_s26 }
   0x3   :  { %15 = vsyncpa [#allocation4], 0  ;;  %s2220_s27 = smov [#allocation5]   ;;  %s55_s8 = sshll.u32 %s2342_s3, 4  ;;  %s56_s8 = int_to_ptr.hbm [resolvable:$true] %s55_s8 }
   0x4   :  { %s34_s28 = sshll.u32 %s2220_s27, 4  ;;  %s2221_s9 = smov [#allocation8]   ;;  %s35_s28 = int_to_ptr.vmem [resolvable:$true] %s34_s28 }
   0x5   :  { %37 = dma.hbm_to_vmem [thread:$0]  %s33_s26, 128, %s35_s28, [#allocation6]  }
   0x6   :  { %s57_s10 = sshll.u32 %s2221_s9, 4  ;;  %s21_s13 = sshll.u32 %s2339_s0, 4  ;;  %s58_s10 = int_to_ptr.vmem [resolvable:$true] %s57_s10  ;;  %s22_s13 = int_to_ptr.hbm [resolvable:$true] %s21_s13 }
   0x7   :  { %s2222_s1 = smov 128   ;;  %s2223_s14 = smov 8  }
   0x8   :  { %63 = dma.hbm_to_vmem [thread:$0]  %s56_s8, 512, %s58_s10, [#allocation9], %s2222_s1, %s2222_s1, %s2223_s14  }
   0x9   :  { %s42_s17 = sshll.u32 %s2341_s2, 4  ;;  %s2224_s18 = smov [#allocation2]   ;;  %s43_s17 = int_to_ptr.hbm [resolvable:$true] %s42_s17 }
   0xa   :  { %s23_s19 = sshll.u32 %s2224_s18, 4  ;;  %s2225_s3 = smov [#allocation7]   ;;  %s24_s19 = int_to_ptr.vmem [resolvable:$true] %s23_s19 }
   0xb   :  { %26 = dma.hbm_to_vmem [thread:$0]  %s22_s13, 1024, %s24_s19, [#allocation3]  }
   0xc   :  { %s44_s20 = sshll.u32 %s2225_s3, 4  ;;  %s70_s0 = sshll.u32 %s2344_s5, 4  ;;  %s45_s20 = int_to_ptr.vmem [resolvable:$true] %s44_s20  ;;  %s71_s0 = int_to_ptr.hbm [resolvable:$true] %s70_s0 }
   0xd   :  { %50 = dma.hbm_to_vmem [thread:$0]  %s43_s17, 16000, %s45_s20, [#allocation6], %s2222_s1, %s2222_s1, %s2223_s14  }
   0xe   :  { %s2226_s23 = smov [#allocation10]   ;;  %s2227_s25 = smov 64  }
   0xf   :  { %s72_s24 = sshll.u32 %s2226_s23, 4  ;;  %s2228_s26 = smov 4   ;;  %s73_s24 = int_to_ptr.vmem [resolvable:$true] %s72_s24 }
  0x10   :  { %78 = dma.hbm_to_vmem [thread:$0]  %s71_s0, 2048, %s73_s24, [#allocation9], %s2227_s25, %s2227_s25, %s2228_s26  }
  0x11   :  { %2212 = dma.done.wait [#allocation3], 1024  }
  0x12   :  { %2213 = vsyncadd [#allocation3], 4294966272 }
  0x13   :  { %2214 = dma.done.wait [#allocation6], 16128  }
  0x14   :  { %2215 = vsyncadd [#allocation6], 4294951168 }
  0x15   :  { %2216 = dma.done.wait [#allocation9], 2560  }
  0x16   :  { %2217 = vsyncadd [#allocation9], 4294964736  ;;  %v1409_v0 = vld [vmem:[#allocation7 + $0x70] sm:$0xf]  ;;  %v1928_v1 = vld [vmem:[#allocation7 + $0x74] sm:$0xf0] }
  0x17   :  { %v1473_v2 = vld [vmem:[#allocation7 + $0xf0] sm:$0xf]  ;;  %v1410_v3 = vor.u32 %v1928_v1, %v1409_v0  ;;  %v1944_v4 = vld [vmem:[#allocation7 + $0xf4] sm:$0xf0]  ;;  %v2039_v5 = vld [vmem:[#allocation8 + $0x14] sm:$0xf] }
  0x18   :  { %v1345_v6 = vld [vmem:[#allocation8 + $0x18] sm:$0xf0]  ;;  %v1474_v7 = vor.u32 %v1944_v4, %v1473_v2  ;;  %v1343_v9 = vld [vmem:[#allocation8 + $0x10] sm:$0xf]  ;;  %v2040_v10 = vld [vmem:[#allocation8 + $0x14] sm:$0xf0] }
  0x19   :  { %v1348_v8 = vor.u32 %v2039_v5, %v1345_v6  ;;  %v1401_v11 = vld [vmem:[#allocation7 + $0x60] sm:$0xf]  ;;  %935 = vmatpush.bf16.msra.mxu2 %v1410_v3  ;;  %v1344_v12 = vor.u32 %v2040_v10, %v1343_v9  ;;  %v1926_v13 = vld [vmem:[#allocation7 + $0x64] sm:$0xf0]  ;;  %v2037_v18 = vld [vmem:[#allocation8 + $0x4] sm:$0xf] }
  0x1a   :  { %v1465_v14 = vld [vmem:[#allocation7 + $0xe0] sm:$0xf]  ;;  %v1942_v15 = vld [vmem:[#allocation7 + $0xe4] sm:$0xf0]  ;;  %948 = vmatpush.bf16.msra.mxu3 %v1474_v7  ;;  %v1402_v16 = vor.u32 %v1926_v13, %v1401_v11  ;;  %v1337_v19 = vld [vmem:[#allocation8 + $0x8] sm:$0xf0] }
  0x1b   :  { %292 = vmatpush.bf16.msra.mxu1 %v1348_v8  ;;  %v1466_v17 = vor.u32 %v1942_v15, %v1465_v14  ;;  %v1601_v20 = vld [vmem:[#allocation7 + $0x1f0] sm:$0xf]  ;;  %279 = vmatpush.bf16.msra.mxu0 %v1344_v12  ;;  %v1340_v21 = vor.u32 %v2037_v18, %v1337_v19  ;;  %v1976_v22 = vld [vmem:[#allocation7 + $0x1f4] sm:$0xf0]  ;;  %v1335_v23 = vld [vmem:[#allocation8] sm:$0xf] }
  0x1c   :  { %v2038_v24 = vld [vmem:[#allocation8 + $0x4] sm:$0xf0]  ;;  %v1602_v25 = vor.u32 %v1976_v22, %v1601_v20  ;;  %v1924_v28 = vld [vmem:[#allocation7 + $0x54] sm:$0xf0]  ;;  %v1593_v36 = vld [vmem:[#allocation7 + $0x1e0] sm:$0xf] }
  0x1d   :  { %v1336_v26 = vor.u32 %v2038_v24, %v1335_v23  ;;  %v1393_v27 = vld [vmem:[#allocation7 + $0x50] sm:$0xf]  ;;  %936 = vmatpush.bf16.msra.mxu2 %v1402_v16  ;;  %v1940_v31 = vld [vmem:[#allocation7 + $0xd4] sm:$0xf0]  ;;  %v1974_v37 = vld [vmem:[#allocation7 + $0x1e4] sm:$0xf0] }
  0x1e   :  { %v1457_v29 = vld [vmem:[#allocation7 + $0xd0] sm:$0xf]  ;;  %v1394_v30 = vor.u32 %v1924_v28, %v1393_v27  ;;  %v1960_v33 = vld [vmem:[#allocation7 + $0x174] sm:$0xf0]  ;;  %949 = vmatpush.bf16.msra.mxu3 %v1466_v17  ;;  %v1385_v38 = vld [vmem:[#allocation7 + $0x40] sm:$0xf]  ;;  %v1594_v39 = vor.u32 %v1974_v37, %v1593_v36 }
  0x1f   :  { %v1537_v32 = vld [vmem:[#allocation7 + $0x170] sm:$0xf]  ;;  %293 = vmatpush.bf16.msra.mxu1 %v1340_v21  ;;  %v1458_v34 = vor.u32 %v1940_v31, %v1457_v29  ;;  %280 = vmatpush.bf16.msra.mxu0 %v1336_v26  ;;  %v1922_v40 = vld [vmem:[#allocation7 + $0x44] sm:$0xf0]  ;;  %v1449_v41 = vld [vmem:[#allocation7 + $0xc0] sm:$0xf] }
  0x20   :  { %v1538_v35 = vor.u32 %v1960_v33, %v1537_v32  ;;  %v1938_v42 = vld [vmem:[#allocation7 + $0xc4] sm:$0xf0]  ;;  %v1529_v43 = vld [vmem:[#allocation7 + $0x160] sm:$0xf]  ;;  %v1585_v45 = vld [vmem:[#allocation7 + $0x1d0] sm:$0xf]  ;;  %v1386_v46 = vor.u32 %v1922_v40, %v1385_v38 }
  0x21   :  { %v1958_v44 = vld [vmem:[#allocation7 + $0x164] sm:$0xf0]  ;;  %937 = vmatpush.bf16.msra.mxu2 %v1394_v30  ;;  %v1972_v48 = vld [vmem:[#allocation7 + $0x1d4] sm:$0xf0]  ;;  %v1450_v49 = vor.u32 %v1938_v42, %v1449_v41  ;;  %v1377_v50 = vld [vmem:[#allocation7 + $0x30] sm:$0xf] }
  0x22   :  { %v1530_v47 = vor.u32 %v1958_v44, %v1529_v43  ;;  %950 = vmatpush.bf16.msra.mxu3 %v1458_v34  ;;  %v1920_v51 = vld [vmem:[#allocation7 + $0x34] sm:$0xf0]  ;;  %v1521_v52 = vld [vmem:[#allocation7 + $0x150] sm:$0xf]  ;;  %v1586_v53 = vor.u32 %v1972_v48, %v1585_v45  ;;  %v1577_v58 = vld [vmem:[#allocation7 + $0x1c0] sm:$0xf] }
  0x23   :  { %974 = vmatpush.bf16.msrb.mxu1 %v1602_v25  ;;  %961 = vmatpush.bf16.msrb.mxu0 %v1538_v35  ;;  %v1441_v54 = vld [vmem:[#allocation7 + $0xb0] sm:$0xf]  ;;  %v1936_v55 = vld [vmem:[#allocation7 + $0xb4] sm:$0xf0]  ;;  %v1970_v59 = vld [vmem:[#allocation7 + $0x1c4] sm:$0xf0]  ;;  %v1378_v60 = vor.u32 %v1920_v51, %v1377_v50 }
  0x24   :  { %v1956_v56 = vld [vmem:[#allocation7 + $0x154] sm:$0xf0]  ;;  %v1513_v61 = vld [vmem:[#allocation7 + $0x140] sm:$0xf]  ;;  %v1954_v62 = vld [vmem:[#allocation7 + $0x144] sm:$0xf0]  ;;  %v1442_v63 = vor.u32 %v1936_v55, %v1441_v54  ;;  %v1578_v2 = vor.u32 %v1970_v59, %v1577_v58 }
  0x25   :  { %v1522_v57 = vor.u32 %v1956_v56, %v1521_v52  ;;  %938 = vmatpush.bf16.msra.mxu2 %v1386_v46  ;;  %v1369_v0 = vld [vmem:[#allocation7 + $0x20] sm:$0xf]  ;;  %v1918_v1 = vld [vmem:[#allocation7 + $0x24] sm:$0xf0]  ;;  %v1514_v5 = vor.u32 %v1954_v62, %v1513_v61  ;;  %v1569_v6 = vld [vmem:[#allocation7 + $0x1b0] sm:$0xf] }
  0x26   :  { %951 = vmatpush.bf16.msra.mxu3 %v1450_v49  ;;  %v1433_v3 = vld [vmem:[#allocation7 + $0xa0] sm:$0xf]  ;;  %v1934_v4 = vld [vmem:[#allocation7 + $0xa4] sm:$0xf0]  ;;  %v1968_v7 = vld [vmem:[#allocation7 + $0x1b4] sm:$0xf0]  ;;  %v1370_v8 = vor.u32 %v1918_v1, %v1369_v0 }
  0x27   :  { %975 = vmatpush.bf16.msrb.mxu1 %v1594_v39  ;;  %962 = vmatpush.bf16.msrb.mxu0 %v1530_v47  ;;  %v1505_v9 = vld [vmem:[#allocation7 + $0x130] sm:$0xf]  ;;  %v1952_v10 = vld [vmem:[#allocation7 + $0x134] sm:$0xf0]  ;;  %v1434_v11 = vor.u32 %v1934_v4, %v1433_v3  ;;  %v1570_v14 = vor.u32 %v1968_v7, %v1569_v6  ;;  %v1561_v17 = vld [vmem:[#allocation7 + $0x1a0] sm:$0xf] }
  0x28   :  { %v1361_v12 = vld [vmem:[#allocation7 + $0x10] sm:$0xf]  ;;  %v1916_v13 = vld [vmem:[#allocation7 + $0x14] sm:$0xf0]  ;;  %v1506_v18 = vor.u32 %v1952_v10, %v1505_v9  ;;  %v1966_v19 = vld [vmem:[#allocation7 + $0x1a4] sm:$0xf0] }
  0x29   :  { %939 = vmatpush.bf16.msra.mxu2 %v1378_v60  ;;  %v1425_v15 = vld [vmem:[#allocation7 + $0x90] sm:$0xf]  ;;  %v1932_v16 = vld [vmem:[#allocation7 + $0x94] sm:$0xf0]  ;;  %v1353_v20 = vld [vmem:[#allocation7] sm:$0xf]  ;;  %v1362_v22 = vor.u32 %v1916_v13, %v1361_v12  ;;  %v1562_v30 = vor.u32 %v1966_v19, %v1561_v17 }
  0x2a   :  { %952 = vmatpush.bf16.msra.mxu3 %v1442_v63  ;;  %v1914_v21 = vld [vmem:[#allocation7 + $0x4] sm:$0xf0]  ;;  %v1417_v23 = vld [vmem:[#allocation7 + $0x80] sm:$0xf]  ;;  %v1426_v26 = vor.u32 %v1932_v16, %v1425_v15  ;;  %v1665_v28 = vld [vmem:[#allocation7 + $0x270] sm:$0xf] }
  0x2b   :  { %976 = vmatpush.bf16.msrb.mxu1 %v1586_v53  ;;  %963 = vmatpush.bf16.msrb.mxu0 %v1522_v57  ;;  %v1497_v24 = vld [vmem:[#allocation7 + $0x120] sm:$0xf]  ;;  %v1950_v25 = vld [vmem:[#allocation7 + $0x124] sm:$0xf0]  ;;  %v118_v29 = vld [vmem:[#allocation5] sm:$0xff]  ;;  %vm269_vm0 = vcmask 261120   ;;  %v1354_v39 = vor.u32 %v1914_v21, %v1353_v20 }
  0x2c   :  { %v1930_v27 = vld [vmem:[#allocation7 + $0x84] sm:$0xf0]  ;;  %v1992_v31 = vld [vmem:[#allocation7 + $0x274] sm:$0xf0]  ;;  %v1729_v32 = vld [vmem:[#allocation7 + $0x2f0] sm:$0xf]  ;;  %v119_v34 = vpack.c.bf16 %v118_v29, %v118_v29  ;;  %v1498_v35 = vor.u32 %v1950_v25, %v1497_v24 }
  0x2d   :  { %940 = vmatpush.bf16.msra.mxu2 %v1370_v8  ;;  %v2008_v33 = vld [vmem:[#allocation7 + $0x2f4] sm:$0xf0]  ;;  %v1553_v36 = vld [vmem:[#allocation7 + $0x190] sm:$0xf]  ;;  %v2285_v38 = vld [vmem:[#allocation7 + $0x3e0] sm:$0xff]  ;;  %v1418_v43 = vor.u32 %v1930_v27, %v1417_v23  ;;  %v1666_v44 = vor.u32 %v1992_v31, %v1665_v28  ;;  %vm928_vm1 = vcmask 1043456  }
  0x2e   :  { %953 = vmatpush.bf16.msra.mxu3 %v1434_v11  ;;  %v1964_v37 = vld [vmem:[#allocation7 + $0x194] sm:$0xf0]  ;;  %v1489_v40 = vld [vmem:[#allocation7 + $0x110] sm:$0xf]  ;;  %1349 = vmatmul.msk.bf16.vlgmr.msra.gmra.mxu0 %vm269_vm0, %v119_v34  ;;  %v672_v42 = vunpack.c.l.b16 %v2285_v38  ;;  %v1657_v45 = vld [vmem:[#allocation7 + $0x260] sm:$0xf]  ;;  %v1730_v47 = vor.u32 %v2008_v33, %v1729_v32 }
  0x2f   :  { %977 = vmatpush.bf16.msrb.mxu1 %v1578_v2  ;;  %964 = vmatpush.bf16.msrb.mxu0 %v1514_v5  ;;  %v1948_v41 = vld [vmem:[#allocation7 + $0x114] sm:$0xf0]  ;;  %v1990_v46 = vld [vmem:[#allocation7 + $0x264] sm:$0xf0]  ;;  %v1554_v48 = vor.u32 %v1964_v37, %v1553_v36  ;;  %v1721_v49 = vld [vmem:[#allocation7 + $0x2e0] sm:$0xf] }
  0x30   :  { %1350 = vmatmul.msk.bf16.vlgmr.msra.gmra.mxu1 %vm269_vm0, %v119_v34  ;;  %v2006_v50 = vld [vmem:[#allocation7 + $0x2e4] sm:$0xf0]  ;;  %v102_v51 = vld [vmem:[#allocation2] sm:$0xff]  ;;  %v1490_v52 = vor.u32 %v1948_v41, %v1489_v40  ;;  %v1545_v53 = vld [vmem:[#allocation7 + $0x180] sm:$0xf]  ;;  %v798_v57 = vpack.c.b16 %v672_v42, %v672_v42  ;;  %v1658_v61 = vor.u32 %v1990_v46, %v1657_v45  ;;  %vm924_vm2 = vcmask 850944  }
  0x31   :  { %941 = vmatpush.bf16.msra.mxu2 %v1362_v22  ;;  %v1962_v54 = vld [vmem:[#allocation7 + $0x184] sm:$0xf0]  ;;  %v2290_v55 = vpack.c.bf16 %v102_v51, %v102_v51  ;;  %v103_v56 = vld [vmem:[#allocation2 + $0x8] sm:$0xff]  ;;  %v1793_v62 = vld [vmem:[#allocation7 + $0x370] sm:$0xf]  ;;  %v1722_v0 = vor.u32 %v2006_v50, %v1721_v49  ;;  %s2229_s28 = smov [#allocation11]  }
  0x32   :  { %954 = vmatpush.bf16.msra.mxu3 %v1426_v26  ;;  %v1481_v58 = vld [vmem:[#allocation7 + $0x100] sm:$0xf]  ;;  %v1946_v59 = vld [vmem:[#allocation7 + $0x104] sm:$0xf0]  ;;  %v2292_v60 = vpack.c.bf16 %v103_v56, %v103_v56  ;;  %v2024_v63 = vld [vmem:[#allocation7 + $0x374] sm:$0xf0]  ;;  %v1546_v1 = vor.u32 %v1962_v54, %v1545_v53 }
  0x33   :  { %978 = vmatpush.bf16.msrb.mxu1 %v1570_v14  ;;  %965 = vmatpush.bf16.msrb.mxu0 %v1506_v18  ;;  %v1649_v2 = vld [vmem:[#allocation7 + $0x250] sm:$0xf]  ;;  %v1988_v3 = vld [vmem:[#allocation7 + $0x254] sm:$0xf0]  ;;  %v1482_v4 = vor.u32 %v1946_v59, %v1481_v58  ;;  %v930_v7 = vsel %vm928_vm1, %v798_v57, 0  ;;  %v1794_v8 = vor.u32 %v2024_v63, %v1793_v62  ;;  %v104_v17 = vld [vmem:[#allocation2 + $0x10] sm:$0xff] }
  0x34   :  { %v1713_v5 = vld [vmem:[#allocation7 + $0x2d0] sm:$0xf]  ;;  %v2004_v6 = vld [vmem:[#allocation7 + $0x2d4] sm:$0xf0]  ;;  %v1650_v11 = vor.u32 %v1988_v3, %v1649_v2  ;;  %v1785_v12 = vld [vmem:[#allocation7 + $0x360] sm:$0xf]  ;;  %v2297_v28 = vpack.c.bf16 %v104_v17, %v104_v17 }
  0x35   :  { %942 = vmatpush.bf16.msra.mxu2 %v1354_v39  ;;  %v1841_v9 = vld [vmem:[#allocation7 + $0x3d0] sm:$0xf]  ;;  %v2036_v10 = vld [vmem:[#allocation7 + $0x3d4] sm:$0xf0]  ;;  %v2022_v13 = vld [vmem:[#allocation7 + $0x364] sm:$0xf0]  ;;  %v1714_v14 = vor.u32 %v2004_v6, %v1713_v5 }
  0x36   :  { %955 = vmatpush.bf16.msra.mxu3 %v1418_v43  ;;  %v1641_v15 = vld [vmem:[#allocation7 + $0x240] sm:$0xf]  ;;  %v1986_v16 = vld [vmem:[#allocation7 + $0x244] sm:$0xf0]  ;;  %v1842_v18 = vor.u32 %v2036_v10, %v1841_v9  ;;  %v105_v21 = vld [vmem:[#allocation2 + $0x18] sm:$0xff]  ;;  %v1786_v22 = vor.u32 %v2022_v13, %v1785_v12  ;;  %s1319_s29 = sshll.u32 %s2229_s28, 4  ;;  %s1320_s29 = int_to_ptr.vmem [resolvable:$true] %s1319_s29 }
  0x37   :  { %979 = vmatpush.bf16.msrb.mxu1 %v1562_v30  ;;  %966 = vmatpush.bf16.msrb.mxu0 %v1498_v35  ;;  %v1705_v19 = vld [vmem:[#allocation7 + $0x2c0] sm:$0xf]  ;;  %v2002_v20 = vld [vmem:[#allocation7 + $0x2c4] sm:$0xf0]  ;;  %v1642_v25 = vor.u32 %v1986_v16, %v1641_v15  ;;  %v1777_v26 = vld [vmem:[#allocation7 + $0x350] sm:$0xf]  ;;  %v2299_v32 = vpack.c.bf16 %v105_v21, %v105_v21 }
  0x38   :  { %943 = vmatmul.bf16.vlgmr.msra.gmra.mxu2 %v2290_v55  ;;  %v1833_v23 = vld [vmem:[#allocation7 + $0x3c0] sm:$0xf]  ;;  %v2034_v24 = vld [vmem:[#allocation7 + $0x3c4] sm:$0xf0]  ;;  %v2020_v27 = vld [vmem:[#allocation7 + $0x354] sm:$0xf0]  ;;  %v1706_v29 = vor.u32 %v2002_v20, %v1705_v19 }
  0x39   :  { %987 = vmatpush.bf16.msrb.mxu2 %v1666_v44  ;;  %956 = vmatmul.bf16.vlgmr.msra.gmra.mxu3 %v2292_v60  ;;  %v1633_v30 = vld [vmem:[#allocation7 + $0x230] sm:$0xf]  ;;  %v1984_v31 = vld [vmem:[#allocation7 + $0x234] sm:$0xf0]  ;;  %v1834_v33 = vor.u32 %v2034_v24, %v1833_v23  ;;  %v1778_v36 = vor.u32 %v2020_v27, %v1777_v26  ;;  %v1769_v41 = vld [vmem:[#allocation7 + $0x340] sm:$0xf] }
  0x3a   :  { %1000 = vmatpush.bf16.msrb.mxu3 %v1730_v47  ;;  %v1697_v34 = vld [vmem:[#allocation7 + $0x2b0] sm:$0xf]  ;;  %v2000_v35 = vld [vmem:[#allocation7 + $0x2b4] sm:$0xf0]  ;;  %v1634_v40 = vor.u32 %v1984_v31, %v1633_v30  ;;  %v2018_v42 = vld [vmem:[#allocation7 + $0x344] sm:$0xf0] }
  0x3b   :  { %980 = vmatpush.bf16.msrb.mxu1 %v1554_v48  ;;  %967 = vmatpush.bf16.msrb.mxu0 %v1490_v52  ;;  %v1825_v37 = vld [vmem:[#allocation7 + $0x3b0] sm:$0xf]  ;;  %v2032_v39 = vld [vmem:[#allocation7 + $0x3b4] sm:$0xf0]  ;;  %v1698_v43 = vor.u32 %v2000_v35, %v1697_v34  ;;  %v1625_v44 = vld [vmem:[#allocation7 + $0x220] sm:$0xf]  ;;  %v1770_v49 = vor.u32 %v2018_v42, %v1769_v41 }
  0x3c   :  { %v1982_v45 = vld [vmem:[#allocation7 + $0x224] sm:$0xf0]  ;;  %v1826_v46 = vor.u32 %v2032_v39, %v1825_v37  ;;  %v1689_v47 = vld [vmem:[#allocation7 + $0x2a0] sm:$0xf]  ;;  %v1761_v53 = vld [vmem:[#allocation7 + $0x330] sm:$0xf] }
  0x3d   :  { %988 = vmatpush.bf16.msrb.mxu2 %v1658_v61  ;;  %v1998_v48 = vld [vmem:[#allocation7 + $0x2a4] sm:$0xf0]  ;;  %v1817_v50 = vld [vmem:[#allocation7 + $0x3a0] sm:$0xf]  ;;  %v1626_v52 = vor.u32 %v1982_v45, %v1625_v44  ;;  %v2016_v54 = vld [vmem:[#allocation7 + $0x334] sm:$0xf0] }
  0x3e   :  { %1001 = vmatpush.bf16.msrb.mxu3 %v1722_v0  ;;  %v2030_v51 = vld [vmem:[#allocation7 + $0x3a4] sm:$0xf0]  ;;  %v1690_v56 = vor.u32 %v1998_v48, %v1689_v47  ;;  %v1617_v57 = vld [vmem:[#allocation7 + $0x210] sm:$0xf]  ;;  %v1980_v58 = vld [vmem:[#allocation7 + $0x214] sm:$0xf0]  ;;  %v1762_v63 = vor.u32 %v2016_v54, %v1761_v53 }
  0x3f   :  { %981 = vmatpush.bf16.msrb.mxu1 %v1546_v1  ;;  %968 = vmatpush.bf16.msrb.mxu0 %v1482_v4  ;;  %v1818_v59 = vor.u32 %v2030_v51, %v1817_v50  ;;  %v1681_v61 = vld [vmem:[#allocation7 + $0x290] sm:$0xf]  ;;  %v1996_v62 = vld [vmem:[#allocation7 + $0x294] sm:$0xf0]  ;;  %v1618_v2 = vor.u32 %v1980_v58, %v1617_v57  ;;  %v1609_v3 = vld [vmem:[#allocation7 + $0x200] sm:$0xf] }
  0x40   :  { %v1809_v0 = vld [vmem:[#allocation7 + $0x390] sm:$0xf]  ;;  %v2028_v1 = vld [vmem:[#allocation7 + $0x394] sm:$0xf0]  ;;  %v1753_v4 = vld [vmem:[#allocation7 + $0x320] sm:$0xf]  ;;  %v1682_v6 = vor.u32 %v1996_v62, %v1681_v61 }
  0x41   :  { %989 = vmatpush.bf16.msrb.mxu2 %v1650_v11  ;;  %v2014_v5 = vld [vmem:[#allocation7 + $0x324] sm:$0xf0]  ;;  %v1810_v10 = vor.u32 %v2028_v1, %v1809_v0  ;;  %v1927_v11 = vld [vmem:[#allocation7 + $0x74] sm:$0xf]  ;;  %v1411_v12 = vld [vmem:[#allocation7 + $0x78] sm:$0xf0] }
  0x42   :  { %1002 = vmatpush.bf16.msrb.mxu3 %v1714_v14  ;;  %969 = vmatmul.bf16.vlgmr.msrb.gmra.mxu0 %v2297_v28  ;;  %v1994_v9 = vld [vmem:[#allocation7 + $0x284] sm:$0xf0]  ;;  %v1943_v13 = vld [vmem:[#allocation7 + $0xf4] sm:$0xf]  ;;  %v1754_v14 = vor.u32 %v2014_v5, %v1753_v4  ;;  %v1475_v15 = vld [vmem:[#allocation7 + $0xf8] sm:$0xf0]  ;;  %v1414_v23 = vor.u32 %v1927_v11, %v1411_v12 }
  0x43   :  { %1027 = vmatpush.bf16.msra.mxu1 %v930_v7  ;;  %1013 = vmatpush.bf16.msra.mxu0 %v1794_v8  ;;  %v1978_v7 = vld [vmem:[#allocation7 + $0x204] sm:$0xf0]  ;;  %v1673_v8 = vld [vmem:[#allocation7 + $0x280] sm:$0xf]  ;;  %v106_v19 = vld [vmem:[#allocation2 + $0x20] sm:$0xff]  ;;  %v1478_v27 = vor.u32 %v1943_v13, %v1475_v15  ;;  %s1321_s9 = sshll.u32 %s2346_s7, 4  ;;  %s1322_s9 = int_to_ptr.hbm [resolvable:$true] %s1321_s9 }
  0x44   :  { %982 = vmatmul.bf16.vlgmr.msrb.gmra.mxu1 %v2299_v32  ;;  %v1801_v16 = vld [vmem:[#allocation7 + $0x380] sm:$0xf]  ;;  %v2026_v17 = vld [vmem:[#allocation7 + $0x384] sm:$0xf0]  ;;  %v1959_v20 = vld [vmem:[#allocation7 + $0x174] sm:$0xf]  ;;  %v2303_v34 = vpack.c.bf16 %v106_v19, %v106_v19 }
  0x45   :  { %990 = vmatpush.bf16.msrb.mxu2 %v1642_v25  ;;  %v1539_v21 = vld [vmem:[#allocation7 + $0x178] sm:$0xf0]  ;;  %v1745_v24 = vld [vmem:[#allocation7 + $0x310] sm:$0xf]  ;;  %v2012_v25 = vld [vmem:[#allocation7 + $0x314] sm:$0xf0] }
  0x46   :  { %1003 = vmatpush.bf16.msrb.mxu3 %v1706_v29  ;;  %v107_v26 = vld [vmem:[#allocation2 + $0x28] sm:$0xff]  ;;  %v1802_v29 = vor.u32 %v2026_v17, %v1801_v16  ;;  %v1403_v31 = vld [vmem:[#allocation7 + $0x68] sm:$0xf0]  ;;  %v1542_v35 = vor.u32 %v1959_v20, %v1539_v21  ;;  %v1746_v39 = vor.u32 %v2012_v25, %v1745_v24  ;;  %v2010_v45 = vld [vmem:[#allocation7 + $0x304] sm:$0xf0] }
  0x47   :  { %1028 = vmatpush.bf16.msra.mxu1 %v1842_v18  ;;  %1014 = vmatpush.bf16.msra.mxu0 %v1786_v22  ;;  %v1610_v18 = vor.u32 %v1978_v7, %v1609_v3  ;;  %v1674_v22 = vor.u32 %v1994_v9, %v1673_v8  ;;  %v1925_v30 = vld [vmem:[#allocation7 + $0x64] sm:$0xf]  ;;  %v1467_v37 = vld [vmem:[#allocation7 + $0xe8] sm:$0xf0]  ;;  %v1737_v44 = vld [vmem:[#allocation7 + $0x300] sm:$0xf] }
  0x48   :  { %v1957_v41 = vld [vmem:[#allocation7 + $0x164] sm:$0xf]  ;;  %v1531_v42 = vld [vmem:[#allocation7 + $0x168] sm:$0xf0]  ;;  %v1975_v50 = vld [vmem:[#allocation7 + $0x1f4] sm:$0xf] }
  0x49   :  { %991 = vmatpush.bf16.msrb.mxu2 %v1634_v40  ;;  %v2305_v40 = vpack.c.bf16 %v107_v26, %v107_v26  ;;  %v1603_v51 = vld [vmem:[#allocation7 + $0x1f8] sm:$0xf0]  ;;  %v1939_v53 = vld [vmem:[#allocation7 + $0xd4] sm:$0xf]  ;;  %v1387_v1 = vld [vmem:[#allocation7 + $0x48] sm:$0xf0] }
  0x4a   :  { %1004 = vmatpush.bf16.msrb.mxu3 %v1698_v43  ;;  %v1406_v43 = vor.u32 %v1925_v30, %v1403_v31  ;;  %v1459_v54 = vld [vmem:[#allocation7 + $0xd8] sm:$0xf0]  ;;  %v1955_v57 = vld [vmem:[#allocation7 + $0x154] sm:$0xf]  ;;  %v1606_v62 = vor.u32 %v1975_v50, %v1603_v51  ;;  %v1595_v3 = vld [vmem:[#allocation7 + $0x1e8] sm:$0xf0] }
  0x4b   :  { %1029 = vmatpush.bf16.msra.mxu1 %v1834_v33  ;;  %1015 = vmatpush.bf16.msra.mxu0 %v1778_v36  ;;  %v109_v33 = vld [vmem:[#allocation2 + $0x38] sm:$0xff]  ;;  %v1941_v36 = vld [vmem:[#allocation7 + $0xe4] sm:$0xf]  ;;  %v1523_v58 = vld [vmem:[#allocation7 + $0x158] sm:$0xf0]  ;;  %v1462_v0 = vor.u32 %v1939_v53, %v1459_v54 }
  0x4c   :  { %v2307_v47 = vpack.c.bf16 %v109_v33, %v109_v33  ;;  %v1470_v48 = vor.u32 %v1941_v36, %v1467_v37  ;;  %v1526_v4 = vor.u32 %v1955_v57, %v1523_v58  ;;  %v1451_v7 = vld [vmem:[#allocation7 + $0xc8] sm:$0xf0]  ;;  %v1953_v8 = vld [vmem:[#allocation7 + $0x144] sm:$0xf]  ;;  %v1919_v12 = vld [vmem:[#allocation7 + $0x34] sm:$0xf] }
  0x4d   :  { %992 = vmatpush.bf16.msrb.mxu2 %v1626_v52  ;;  %v1534_v52 = vor.u32 %v1957_v41, %v1531_v42  ;;  %v1515_v9 = vld [vmem:[#allocation7 + $0x148] sm:$0xf0]  ;;  %v1971_v15 = vld [vmem:[#allocation7 + $0x1d4] sm:$0xf]  ;;  %v1587_v16 = vld [vmem:[#allocation7 + $0x1d8] sm:$0xf0] }
  0x4e   :  { %1005 = vmatpush.bf16.msrb.mxu3 %v1690_v56  ;;  %v1738_v56 = vor.u32 %v2010_v45, %v1737_v44  ;;  %v1518_v17 = vor.u32 %v1953_v8, %v1515_v9  ;;  %v1443_v19 = vld [vmem:[#allocation7 + $0xb8] sm:$0xf0]  ;;  %v1951_v20 = vld [vmem:[#allocation7 + $0x134] sm:$0xf]  ;;  %v1917_v24 = vld [vmem:[#allocation7 + $0x24] sm:$0xf] }
  0x4f   :  { %1030 = vmatpush.bf16.msra.mxu1 %v1826_v46  ;;  %1016 = vmatpush.bf16.msra.mxu0 %v1770_v49  ;;  %v1923_v46 = vld [vmem:[#allocation7 + $0x54] sm:$0xf]  ;;  %v1395_v49 = vld [vmem:[#allocation7 + $0x58] sm:$0xf0]  ;;  %v1371_v26 = vld [vmem:[#allocation7 + $0x28] sm:$0xf0] }
  0x50   :  { %v1398_v61 = vor.u32 %v1923_v46, %v1395_v49  ;;  %v1507_v21 = vld [vmem:[#allocation7 + $0x138] sm:$0xf0]  ;;  %v1933_v31 = vld [vmem:[#allocation7 + $0xa4] sm:$0xf]  ;;  %v1435_v33 = vld [vmem:[#allocation7 + $0xa8] sm:$0xf0]  ;;  %v1374_v37 = vor.u32 %v1917_v24, %v1371_v26 }
  0x51   :  { %993 = vmatpush.bf16.msrb.mxu2 %v1618_v2  ;;  %v1973_v2 = vld [vmem:[#allocation7 + $0x1e4] sm:$0xf]  ;;  %v1510_v30 = vor.u32 %v1951_v20, %v1507_v21  ;;  %v1499_v36 = vld [vmem:[#allocation7 + $0x128] sm:$0xf0]  ;;  %v1915_v41 = vld [vmem:[#allocation7 + $0x14] sm:$0xf]  ;;  %v1438_v42 = vor.u32 %v1933_v31, %v1435_v33 }
  0x52   :  { %1006 = vmatpush.bf16.msrb.mxu3 %v1682_v6  ;;  %v1937_v6 = vld [vmem:[#allocation7 + $0xc4] sm:$0xf]  ;;  %v1598_v11 = vor.u32 %v1973_v2, %v1595_v3  ;;  %v1967_v44 = vld [vmem:[#allocation7 + $0x1b4] sm:$0xf]  ;;  %v1571_v45 = vld [vmem:[#allocation7 + $0x1b8] sm:$0xf0] }
  0x53   :  { %1031 = vmatpush.bf16.msra.mxu1 %v1818_v59  ;;  %1017 = vmatpush.bf16.msra.mxu0 %v1762_v63  ;;  %v108_v59 = vld [vmem:[#allocation2 + $0x30] sm:$0xff]  ;;  %v1921_v63 = vld [vmem:[#allocation7 + $0x44] sm:$0xf]  ;;  %v1454_v13 = vor.u32 %v1937_v6, %v1451_v7  ;;  %v1427_v49 = vld [vmem:[#allocation7 + $0x98] sm:$0xf0]  ;;  %v1574_v53 = vor.u32 %v1967_v44, %v1571_v45 }
  0x54   :  { %v2313_v5 = vpack.c.bf16 %v108_v59, %v108_v59  ;;  %v1947_v50 = vld [vmem:[#allocation7 + $0x114] sm:$0xf]  ;;  %v1491_v51 = vld [vmem:[#allocation7 + $0x118] sm:$0xf0]  ;;  %v1913_v54 = vld [vmem:[#allocation7 + $0x4] sm:$0xf] }
  0x55   :  { %994 = vmatpush.bf16.msrb.mxu2 %v1610_v18  ;;  %v1935_v18 = vld [vmem:[#allocation7 + $0xb4] sm:$0xf]  ;;  %v1929_v57 = vld [vmem:[#allocation7 + $0x84] sm:$0xf]  ;;  %v1419_v59 = vld [vmem:[#allocation7 + $0x88] sm:$0xf0] }
  0x56   :  { %1007 = vmatpush.bf16.msrb.mxu3 %v1674_v22  ;;  %v1446_v25 = vor.u32 %v1935_v18, %v1443_v19  ;;  %v2007_v2 = vld [vmem:[#allocation7 + $0x2f4] sm:$0xf]  ;;  %v1731_v3 = vld [vmem:[#allocation7 + $0x2f8] sm:$0xf0]  ;;  %v1483_v6 = vld [vmem:[#allocation7 + $0x108] sm:$0xf0] }
  0x57   :  { %1032 = vmatpush.bf16.msra.mxu1 %v1810_v10  ;;  %1018 = vmatpush.bf16.msra.mxu0 %v1754_v14  ;;  %v1390_v10 = vor.u32 %v1921_v63, %v1387_v1  ;;  %v1379_v14 = vld [vmem:[#allocation7 + $0x38] sm:$0xf0]  ;;  %v1494_v63 = vor.u32 %v1947_v50, %v1491_v51  ;;  %v2023_v9 = vld [vmem:[#allocation7 + $0x374] sm:$0xf]  ;;  %v1989_v18 = vld [vmem:[#allocation7 + $0x264] sm:$0xf] }
  0x58   :  { %995 = vmatmul.bf16.vlgmr.msrb.gmra.mxu2 %v2303_v34  ;;  %v1382_v22 = vor.u32 %v1919_v12, %v1379_v14  ;;  %v1667_v1 = vld [vmem:[#allocation7 + $0x278] sm:$0xf0]  ;;  %v1659_v19 = vld [vmem:[#allocation7 + $0x268] sm:$0xf0]  ;;  %v2005_v21 = vld [vmem:[#allocation7 + $0x2e4] sm:$0xf] }
  0x59   :  { %1039 = vmatpush.bf16.msra.mxu2 %v1414_v23  ;;  %1008 = vmatmul.bf16.vlgmr.msrb.gmra.mxu3 %v2305_v40  ;;  %v1590_v23 = vor.u32 %v1971_v15, %v1587_v16  ;;  %v1555_v14 = vld [vmem:[#allocation7 + $0x198] sm:$0xf0]  ;;  %v673_v15 = vunpack.c.h.b16 %v2285_v38  ;;  %v1734_v16 = vor.u32 %v2007_v2, %v1731_v3  ;;  %v2021_v24 = vld [vmem:[#allocation7 + $0x364] sm:$0xf]  ;;  %v1662_v26 = vor.u32 %v1989_v18, %v1659_v19  ;;  %v1987_v31 = vld [vmem:[#allocation7 + $0x254] sm:$0xf] }
  0x5a   :  { %1052 = vmatpush.bf16.msra.mxu3 %v1478_v27  ;;  %v1969_v27 = vld [vmem:[#allocation7 + $0x1c4] sm:$0xf]  ;;  %v1651_v33 = vld [vmem:[#allocation7 + $0x258] sm:$0xf0] }
  0x5b   :  { %1033 = vmatpush.bf16.msra.mxu1 %v1802_v29  ;;  %1019 = vmatpush.bf16.msra.mxu0 %v1746_v39  ;;  %v1579_v29 = vld [vmem:[#allocation7 + $0x1c8] sm:$0xf0]  ;;  %v1985_v45 = vld [vmem:[#allocation7 + $0x244] sm:$0xf]  ;;  %v1763_v2 = vld [vmem:[#allocation7 + $0x338] sm:$0xf0] }
  0x5c   :  { %v1582_v39 = vor.u32 %v1969_v27, %v1579_v29  ;;  %v1961_v27 = vld [vmem:[#allocation7 + $0x184] sm:$0xf]  ;;  %v1547_v29 = vld [vmem:[#allocation7 + $0x188] sm:$0xf0]  ;;  %v1619_v19 = vld [vmem:[#allocation7 + $0x218] sm:$0xf0] }
  0x5d   :  { %1040 = vmatpush.bf16.msra.mxu2 %v1406_v43  ;;  %v1363_v43 = vld [vmem:[#allocation7 + $0x18] sm:$0xf0]  ;;  %v2001_v51 = vld [vmem:[#allocation7 + $0x2c4] sm:$0xf] }
  0x5e   :  { %1847 = vmatmul.msk.bf16.vlgmr.msra.gmra.mxu1 %vm924_vm2, %v2307_v47  ;;  %1053 = vmatpush.bf16.msra.mxu3 %v1470_v48  ;;  %v1931_v48 = vld [vmem:[#allocation7 + $0x94] sm:$0xf] }
  0x5f   :  { %1065 = vmatpush.bf16.msrb.mxu1 %v1542_v35  ;;  %1020 = vmatpush.bf16.msra.mxu0 %v1738_v56  ;;  %v1949_v35 = vld [vmem:[#allocation7 + $0x124] sm:$0xf]  ;;  %v1355_v56 = vld [vmem:[#allocation7 + $0x8] sm:$0xf0]  ;;  %v1430_v58 = vor.u32 %v1931_v48, %v1427_v49  ;;  %v2035_v48 = vld [vmem:[#allocation7 + $0x3d4] sm:$0xf] }
  0x60   :  { %v1502_v46 = vor.u32 %v1949_v35, %v1499_v36  ;;  %v1358_v7 = vor.u32 %v1913_v54, %v1355_v56  ;;  %v2003_v36 = vld [vmem:[#allocation7 + $0x2d4] sm:$0xf]  ;;  %v1843_v49 = vld [vmem:[#allocation7 + $0x3d8] sm:$0xf0] }
  0x61   :  { %1041 = vmatpush.bf16.msra.mxu2 %v1398_v61  ;;  %v1965_v61 = vld [vmem:[#allocation7 + $0x1a4] sm:$0xf]  ;;  %v1846_v56 = vor.u32 %v2035_v48, %v1843_v49 }
  0x62   :  { %1054 = vmatpush.bf16.msra.mxu3 %v1462_v0  ;;  %1021 = vmatmul.bf16.vlgmr.msra.gmra.mxu0 %v2313_v5  ;;  %v1991_v0 = vld [vmem:[#allocation7 + $0x274] sm:$0xf] }
  0x63   :  { %1066 = vmatpush.bf16.msrb.mxu1 %v1534_v52  ;;  %1078 = vmatpush.bf16.msrb.mxu0 %v1606_v62  ;;  %v1366_v52 = vor.u32 %v1915_v41, %v1363_v43  ;;  %v1563_v62 = vld [vmem:[#allocation7 + $0x1a8] sm:$0xf0]  ;;  %v1670_v12 = vor.u32 %v1991_v0, %v1667_v1  ;;  %v2019_v41 = vld [vmem:[#allocation7 + $0x354] sm:$0xf]  ;;  %v1654_v43 = vor.u32 %v1987_v31, %v1651_v33  ;;  %v1699_v0 = vld [vmem:[#allocation7 + $0x2b8] sm:$0xf0] }
  0x64   :  { %v1566_v8 = vor.u32 %v1965_v61, %v1563_v62  ;;  %v1835_v61 = vld [vmem:[#allocation7 + $0x3c8] sm:$0xf0]  ;;  %v2015_v1 = vld [vmem:[#allocation7 + $0x334] sm:$0xf] }
  0x65   :  { %1042 = vmatpush.bf16.msra.mxu2 %v1390_v10  ;;  %v1795_v10 = vld [vmem:[#allocation7 + $0x378] sm:$0xf0]  ;;  %v1611_v31 = vld [vmem:[#allocation7 + $0x208] sm:$0xf0]  ;;  %v2027_v33 = vld [vmem:[#allocation7 + $0x394] sm:$0xf] }
  0x66   :  { %1055 = vmatpush.bf16.msra.mxu3 %v1454_v13  ;;  %v1963_v13 = vld [vmem:[#allocation7 + $0x194] sm:$0xf]  ;;  %v1798_v20 = vor.u32 %v2023_v9, %v1795_v10  ;;  %v1827_v10 = vld [vmem:[#allocation7 + $0x3b8] sm:$0xf0] }
  0x67   :  { %1067 = vmatpush.bf16.msrb.mxu1 %v1526_v4  ;;  %1079 = vmatpush.bf16.msrb.mxu0 %v1598_v11  ;;  %v1945_v4 = vld [vmem:[#allocation7 + $0x104] sm:$0xf]  ;;  %v1422_v11 = vor.u32 %v1929_v57, %v1419_v59  ;;  %v1983_v57 = vld [vmem:[#allocation7 + $0x234] sm:$0xf] }
  0x68   :  { %v2033_v59 = vld [vmem:[#allocation7 + $0x3c4] sm:$0xf]  ;;  %v2031_v9 = vld [vmem:[#allocation7 + $0x3b4] sm:$0xf] }
  0x69   :  { %1043 = vmatpush.bf16.msra.mxu2 %v1382_v22  ;;  %v1723_v22 = vld [vmem:[#allocation7 + $0x2e8] sm:$0xf0] }
  0x6a   :  { %1056 = vmatpush.bf16.msra.mxu3 %v1446_v25  ;;  %v1787_v25 = vld [vmem:[#allocation7 + $0x368] sm:$0xf0]  ;;  %v1726_v38 = vor.u32 %v2005_v21, %v1723_v22 }
  0x6b   :  { %1068 = vmatpush.bf16.msrb.mxu1 %v1518_v17  ;;  %1080 = vmatpush.bf16.msrb.mxu0 %v1590_v23  ;;  %v1486_v17 = vor.u32 %v1945_v4, %v1483_v6  ;;  %v1558_v23 = vor.u32 %v1963_v13, %v1555_v14  ;;  %v1790_v35 = vor.u32 %v2021_v24, %v1787_v25  ;;  %v1981_v6 = vld [vmem:[#allocation7 + $0x224] sm:$0xf]  ;;  %v1691_v13 = vld [vmem:[#allocation7 + $0x2a8] sm:$0xf0]  ;;  %v1683_v24 = vld [vmem:[#allocation7 + $0x298] sm:$0xf0] }
  0x6c   :  { %v1838_v4 = vor.u32 %v2033_v59, %v1835_v61  ;;  %v1755_v14 = vld [vmem:[#allocation7 + $0x328] sm:$0xf0]  ;;  %v2011_v25 = vld [vmem:[#allocation7 + $0x314] sm:$0xf] }
  0x6d   :  { %1044 = vmatpush.bf16.msra.mxu2 %v1374_v37  ;;  %v1715_v37 = vld [vmem:[#allocation7 + $0x2d8] sm:$0xf0]  ;;  %v1819_v21 = vld [vmem:[#allocation7 + $0x3a8] sm:$0xf0] }
  0x6e   :  { %1057 = vmatpush.bf16.msra.mxu3 %v1438_v42  ;;  %v1779_v42 = vld [vmem:[#allocation7 + $0x358] sm:$0xf0] }
  0x6f   :  { %1069 = vmatpush.bf16.msrb.mxu1 %v1510_v30  ;;  %1081 = vmatpush.bf16.msrb.mxu0 %v1582_v39  ;;  %v799_v30 = vpack.c.b16 %v673_v15, %v673_v15  ;;  %v1550_v39 = vor.u32 %v1961_v27, %v1547_v29  ;;  %v1782_v50 = vor.u32 %v2019_v41, %v1779_v42  ;;  %v2009_v41 = vld [vmem:[#allocation7 + $0x304] sm:$0xf]  ;;  %v1739_v42 = vld [vmem:[#allocation7 + $0x308] sm:$0xf0] }
  0x70   :  { %v1742_v48 = vor.u32 %v2009_v41, %v1739_v42 }
  0x71   :  { %1045 = vmatpush.bf16.msra.mxu2 %v1366_v52  ;;  %v933_v44 = vsel %vm928_vm1, %v799_v30, 0  ;;  %v1707_v52 = vld [vmem:[#allocation7 + $0x2c8] sm:$0xf0]  ;;  %v1977_v30 = vld [vmem:[#allocation7 + $0x204] sm:$0xf] }
  0x72   :  { %1058 = vmatpush.bf16.msra.mxu3 %v1430_v58  ;;  %v1635_v58 = vld [vmem:[#allocation7 + $0x238] sm:$0xf0] }
  0x73   :  { %1070 = vmatpush.bf16.msrb.mxu1 %v1502_v46  ;;  %1082 = vmatpush.bf16.msrb.mxu0 %v1574_v53  ;;  %v1718_v46 = vor.u32 %v2003_v36, %v1715_v37  ;;  %v1771_v53 = vld [vmem:[#allocation7 + $0x348] sm:$0xf0]  ;;  %v1638_v3 = vor.u32 %v1983_v57, %v1635_v58  ;;  %v1993_v37 = vld [vmem:[#allocation7 + $0x284] sm:$0xf]  ;;  %v2042_v58 = vld [vmem:[#allocation10 + $0x8] sm:$0xff] }
  0x75   :  { %1046 = vmatpush.bf16.msra.mxu2 %v1358_v7 }
  0x76   :  { %1059 = vmatpush.bf16.msra.mxu3 %v1422_v11  ;;  %v1766_v11 = vor.u32 %v2015_v1, %v1763_v2 }
  0x77   :  { %1071 = vmatpush.bf16.msrb.mxu1 %v1494_v63  ;;  %1083 = vmatpush.bf16.msrb.mxu0 %v1566_v8  ;;  %v1999_v63 = vld [vmem:[#allocation7 + $0x2b4] sm:$0xf]  ;;  %v1627_v8 = vld [vmem:[#allocation7 + $0x228] sm:$0xf0] }
  0x78   :  { %1047 = vmatmul.bf16.vlgmr.msra.gmra.mxu2 %v2290_v55  ;;  %v1643_v55 = vld [vmem:[#allocation7 + $0x248] sm:$0xf0]  ;;  %v1702_v7 = vor.u32 %v1999_v63, %v1699_v0  ;;  %v1630_v15 = vor.u32 %v1981_v6, %v1627_v8 }
  0x79   :  { %1091 = vmatpush.bf16.msrb.mxu2 %v1670_v12  ;;  %1060 = vmatmul.bf16.vlgmr.msra.gmra.mxu3 %v2292_v60  ;;  %v2017_v60 = vld [vmem:[#allocation7 + $0x344] sm:$0xf]  ;;  %v1646_v54 = vor.u32 %v1985_v45, %v1643_v55  ;;  %v1803_v55 = vld [vmem:[#allocation7 + $0x388] sm:$0xf0] }
  0x7a   :  { %1104 = vmatpush.bf16.msrb.mxu3 %v1734_v16  ;;  %v1774_v62 = vor.u32 %v2017_v60, %v1771_v53  ;;  %v1997_v12 = vld [vmem:[#allocation7 + $0x2a4] sm:$0xf]  ;;  %v1830_v16 = vor.u32 %v2031_v9, %v1827_v10  ;;  %v2045_v60 = vld [vmem:[#allocation10 + $0x20] sm:$0xff] }
  0x7b   :  { %1072 = vmatpush.bf16.msrb.mxu1 %v1486_v17  ;;  %1084 = vmatpush.bf16.msrb.mxu0 %v1558_v23  ;;  %v1979_v17 = vld [vmem:[#allocation7 + $0x214] sm:$0xf]  ;;  %v1694_v18 = vor.u32 %v1997_v12, %v1691_v13  ;;  %v1143_v12 = vld [vmem:[%s2343_s4] sm:$0x3] }
  0x7c   :  { %v1995_v23 = vld [vmem:[#allocation7 + $0x294] sm:$0xf]  ;;  %v1622_v27 = vor.u32 %v1979_v17, %v1619_v19 }
  0x7d   :  { %1092 = vmatpush.bf16.msrb.mxu2 %v1662_v26  ;;  %v1747_v26 = vld [vmem:[#allocation7 + $0x318] sm:$0xf0] }
  0x7e   :  { %1073 = vmatmul.bf16.vlgmr.msrb.gmra.mxu1 %v2297_v28  ;;  %1105 = vmatpush.bf16.msrb.mxu3 %v1726_v38  ;;  %v1710_v28 = vor.u32 %v2001_v51, %v1707_v52  ;;  %v1686_v38 = vor.u32 %v1995_v23, %v1683_v24  ;;  %v1750_v36 = vor.u32 %v2011_v25, %v1747_v26  ;;  %v2047_v51 = vld [vmem:[#allocation10 + $0x30] sm:$0xff]  ;;  %v2046_v52 = vld [vmem:[#allocation10 + $0x28] sm:$0xff]  ;;  %v2053_v26 = vld [vmem:[#allocation10 + $0x60] sm:$0xff] }
  0x7f   :  { %1117 = vmatpush.bf16.msra.mxu1 %v1798_v20  ;;  %1085 = vmatpush.bf16.msrb.mxu0 %v1550_v39  ;;  %v2029_v20 = vld [vmem:[#allocation7 + $0x3a4] sm:$0xf]  ;;  %v1675_v39 = vld [vmem:[#allocation7 + $0x288] sm:$0xf0]  ;;  %v2054_v24 = vld [vmem:[#allocation10 + $0x68] sm:$0xff] }
  0x80   :  { %v1822_v29 = vor.u32 %v2029_v20, %v1819_v21  ;;  %v1678_v45 = vor.u32 %v1993_v37, %v1675_v39  ;;  %v2049_v39 = vld [vmem:[#allocation10 + $0x40] sm:$0xff] }
  0x81   :  { %1093 = vmatpush.bf16.msrb.mxu2 %v1654_v43  ;;  %v1614_v43 = vor.u32 %v1977_v30, %v1611_v31 }
  0x82   :  { %1106 = vmatpush.bf16.msrb.mxu3 %v1718_v46  ;;  %1086 = vmatmul.bf16.vlgmr.msrb.gmra.mxu0 %v2299_v32  ;;  %v2013_v32 = vld [vmem:[#allocation7 + $0x324] sm:$0xf] }
  0x83   :  { %1118 = vmatpush.bf16.msra.mxu1 %v1790_v35  ;;  %1131 = vmatpush.bf16.msra.mxu0 %v933_v44  ;;  %v1758_v22 = vor.u32 %v2013_v32, %v1755_v14  ;;  %v1811_v35 = vld [vmem:[#allocation7 + $0x398] sm:$0xf0]  ;;  %v2025_v46 = vld [vmem:[#allocation7 + $0x384] sm:$0xf] }
  0x84   :  { %v1814_v44 = vor.u32 %v2027_v33, %v1811_v35  ;;  %v1806_v49 = vor.u32 %v2025_v46, %v1803_v55 }
  0x85   :  { %1094 = vmatpush.bf16.msrb.mxu2 %v1646_v54 }
  0x86   :  { %1107 = vmatpush.bf16.msrb.mxu3 %v1710_v28 }
  0x87   :  { %1119 = vmatpush.bf16.msra.mxu1 %v1782_v50  ;;  %1132 = vmatpush.bf16.msra.mxu0 %v1846_v56  ;;  %v2048_v50 = vld [vmem:[#allocation10 + $0x38] sm:$0xff] }
  0x89   :  { %1095 = vmatpush.bf16.msrb.mxu2 %v1638_v3 }
  0x8a   :  { %1108 = vmatpush.bf16.msrb.mxu3 %v1702_v7 }
  0x8b   :  { %1120 = vmatpush.bf16.msra.mxu1 %v1774_v62  ;;  %1133 = vmatpush.bf16.msra.mxu0 %v1838_v4  ;;  %v2041_v62 = vld [vmem:[#allocation10] sm:$0xff] }
  0x8d   :  { %1096 = vmatpush.bf16.msrb.mxu2 %v1630_v15  ;;  %v1145_v15 = vperm.slane %v1143_v12, 0 }
  0x8e   :  { %1109 = vmatpush.bf16.msrb.mxu3 %v1694_v18  ;;  %v2055_v18 = vld [vmem:[#allocation10 + $0x70] sm:$0xff] }
  0x8f   :  { %1121 = vmatpush.bf16.msra.mxu1 %v1766_v11  ;;  %1134 = vmatpush.bf16.msra.mxu0 %v1830_v16  ;;  %v2056_v16 = vld [vmem:[#allocation10 + $0x78] sm:$0xff] }
  0x91   :  { %1097 = vmatpush.bf16.msrb.mxu2 %v1622_v27 }
  0x92   :  { %1110 = vmatpush.bf16.msrb.mxu3 %v1686_v38  ;;  %v2051_v38 = vld [vmem:[#allocation10 + $0x50] sm:$0xff] }
  0x93   :  { %1122 = vmatpush.bf16.msra.mxu1 %v1758_v22  ;;  %1135 = vmatpush.bf16.msra.mxu0 %v1822_v29  ;;  %v2052_v29 = vld [vmem:[#allocation10 + $0x58] sm:$0xff] }
  0x95   :  { %1098 = vmatpush.bf16.msrb.mxu2 %v1614_v43 }
  0x96   :  { %1111 = vmatpush.bf16.msrb.mxu3 %v1678_v45 }
  0x97   :  { %1123 = vmatpush.bf16.msra.mxu1 %v1750_v36  ;;  %1136 = vmatpush.bf16.msra.mxu0 %v1814_v44  ;;  %v2050_v36 = vld [vmem:[#allocation10 + $0x48] sm:$0xff] }
  0x98   :  { %1099 = vmatmul.bf16.vlgmr.msrb.gmra.mxu2 %v2303_v34 }
  0x99   :  { %1112 = vmatmul.bf16.vlgmr.msrb.gmra.mxu3 %v2305_v40  ;;  %1287 = vmatpush.bf16.msra.mxu2 %v2048_v50  ;;  %v2044_v40 = vld [vmem:[#allocation10 + $0x18] sm:$0xff] }
  0x9a   :  { %1300 = vmatpush.bf16.msra.mxu3 %v2056_v16 }
  0x9b   :  { %1124 = vmatpush.bf16.msra.mxu1 %v1742_v48  ;;  %1137 = vmatpush.bf16.msra.mxu0 %v1806_v49 }
  0x9d   :  { %1288 = vmatpush.bf16.msra.mxu2 %v2047_v51 }
  0x9e   :  { %1125 = vmatmul.bf16.vlgmr.msra.gmra.mxu1 %v2313_v5  ;;  %1848 = vmatmul.msk.bf16.vlgmr.msra.gmra.mxu0 %vm924_vm2, %v2307_v47  ;;  %v2043_v5 = vld [vmem:[#allocation10 + $0x10] sm:$0xff] }
  0x9f   :  { %1301 = vmatpush.bf16.msra.mxu3 %v2055_v18 }
  0xa1   :  { %1289 = vmatpush.bf16.msra.mxu2 %v2046_v52 }
  0xa3   :  { %1302 = vmatpush.bf16.msra.mxu3 %v2054_v24 }
  0xa5   :  { %1290 = vmatpush.bf16.msra.mxu2 %v2045_v60 }
  0xa7   :  { %1303 = vmatpush.bf16.msra.mxu3 %v2053_v26 }
  0xa9   :  { %1291 = vmatpush.bf16.msra.mxu2 %v2044_v40 }
  0xab   :  { %v282_v53 = vpop.f32.mrf.mxu0  ;;  %1304 = vmatpush.bf16.msra.mxu3 %v2052_v29 }
  0xad   :  { %v2327_v54 = vpop.f32.mrf.mxu1  ;;  %1292 = vmatpush.bf16.msra.mxu2 %v2043_v5 }
  0xaf   :  { %1305 = vmatpush.bf16.msra.mxu3 %v2051_v38 }
  0xb1   :  { %1293 = vmatpush.bf16.msra.mxu2 %v2042_v58 }
  0xb3   :  { %v284_v34 = vpop.f32.mrf.mxu0  ;;  %1306 = vmatpush.bf16.msra.mxu3 %v2050_v36 }
  0xb5   :  { %v297_v56 = vpop.f32.mrf.mxu1  ;;  %1294 = vmatpush.bf16.msra.mxu2 %v2041_v62 }
  0xb7   :  { %1307 = vmatpush.bf16.msra.mxu3 %v2049_v39 }
  0xbb   :  { %v944_v57 = vpop.f32.mrf.mxu2 }
  0xbc   :  { %v957_v28 = vpop.f32.mrf.mxu3  ;;  %v945_v2 = vadd.f32 %v944_v57, %v282_v53  ;;  %v1146_v53 = vperm.slane %v1143_v12, 1 }
  0xbe   :  { %v958_v3 = vadd.f32 %v957_v28, %v945_v2 }
  0xbf   :  { %v970_v47 = vpop.f32.mrf.mxu0 }
  0xc0   :  { %v971_v4 = vadd.f32 %v970_v47, %v958_v3 }
  0xc1   :  { %v983_v59 = vpop.f32.mrf.mxu1 }
  0xc2   :  { %v984_v7 = vadd.f32 %v983_v59, %v971_v4 }
  0xc3   :  { %v946_v61 = vpop.f32.mrf.mxu2 }
  0xc4   :  { %v959_v63 = vpop.f32.mrf.mxu3  ;;  %v2067_v61 = vld [vmem:[%s2345_s6] ss:$0 sm:$0xff] }
  0xc7   :  { %v972_v0 = vpop.f32.mrf.mxu0 }
  0xc9   :  { %v985_v1 = vpop.f32.mrf.mxu1 }
  0xdb   :  { %v1035_v6 = vpop.f32.mrf.mxu1  ;;  %v996_v8 = vpop.f32.mrf.mxu2 }
  0xdc   :  { %v997_v9 = vadd.f32 %v996_v8, %v984_v7  ;;  %v1009_v10 = vpop.f32.mrf.mxu3 }
  0xde   :  { %v1010_v13 = vadd.f32 %v1009_v10, %v997_v9 }
  0xdf   :  { %v1022_v11 = vpop.f32.mrf.mxu0 }
  0xe0   :  { %v1023_v14 = vadd.f32 %v1022_v11, %v1010_v13 }
  0xe2   :  { %v1036_v17 = vadd.f32 %v1035_v6, %v1023_v14 }
  0xe3   :  { %v1037_v32 = vpop.f32.mrf.mxu1  ;;  %v998_v19 = vpop.f32.mrf.mxu2 }
  0xe4   :  { %v1149_v20 = vadd.f32 %v1145_v15, %v1036_v17  ;;  %v1011_v21 = vpop.f32.mrf.mxu3 }
  0xe6   :  { %v1151_v23 = vmax.f32 %v1149_v20, 0.0 }
  0xe7   :  { %v1024_v22 = vpop.f32.mrf.mxu0 }
  0xe8   :  { %v1153_v25 = vpack.c.bf16 %v1151_v23, %v1151_v23 }
  0xea   :  { %1295 = vmatmul.bf16.vlgmr.msra.gmra.mxu2 %v1153_v25 }
  0xfb   :  { %v1074_v27 = vpop.f32.mrf.mxu1  ;;  %v1048_v30 = vpop.f32.mrf.mxu2 }
  0xfc   :  { %v1061_v31 = vpop.f32.mrf.mxu3  ;;  %v1049_v43 = vadd.f32 %v1048_v30, %v2327_v54 }
  0xfe   :  { %v1062_v44 = vadd.f32 %v1061_v31, %v1049_v43 }
  0xff   :  { %v1087_v33 = vpop.f32.mrf.mxu0 }
 0x100   :  { %v1075_v45 = vadd.f32 %v1074_v27, %v1062_v44 }
 0x102   :  { %v1088_v48 = vadd.f32 %v1087_v33, %v1075_v45 }
 0x103   :  { %v1076_v35 = vpop.f32.mrf.mxu1  ;;  %v1050_v37 = vpop.f32.mrf.mxu2 }
 0x104   :  { %v1063_v41 = vpop.f32.mrf.mxu3 }
 0x107   :  { %v1089_v42 = vpop.f32.mrf.mxu0 }
 0x11b   :  { %v1126_v46 = vpop.f32.mrf.mxu1  ;;  %v1139_v55 = vpop.f32.mrf.mxu0 }
 0x11c   :  { %v1100_v49 = vpop.f32.mrf.mxu2  ;;  %v1113_v51 = vpop.f32.mrf.mxu3 }
 0x11d   :  { %v1101_v50 = vadd.f32 %v1100_v49, %v1088_v48 }
 0x11f   :  { %v1114_v52 = vadd.f32 %v1113_v51, %v1101_v50 }
 0x121   :  { %v1127_v34 = vadd.f32 %v1126_v46, %v1114_v52 }
 0x123   :  { %v1128_v60 = vpop.f32.mrf.mxu1  ;;  %v1141_v56 = vpop.f32.mrf.mxu0  ;;  %v1140_v40 = vadd.f32 %v1139_v55, %v1127_v34 }
 0x124   :  { %v1102_v57 = vpop.f32.mrf.mxu2  ;;  %v1115_v28 = vpop.f32.mrf.mxu3 }
 0x125   :  { %v1150_v5 = vadd.f32 %v1146_v53, %v1140_v40 }
 0x127   :  { %v1152_v47 = vmax.f32 %v1150_v5, 0.0 }
 0x129   :  { %v1154_v58 = vpack.c.bf16 %v1152_v47, %v1152_v47 }
 0x12b   :  { %1308 = vmatmul.bf16.vlgmr.msra.gmra.mxu3 %v1154_v58 }
 0x16d   :  { %v1296_v54 = vpop.f32.mrf.mxu2 }
 0x16e   :  { %v1297_v62 = vadd.f32 %v2067_v61, %v1296_v54 }
 0x175   :  { %v1298_v59 = vpop.f32.mrf.mxu2 }
 0x1ae   :  { %v1309_v63 = vpop.f32.mrf.mxu3 }
 0x1af   :  { %v1310_v0 = vadd.f32 %v1309_v63, %v1297_v62 }
 0x1b1   :  { %1313 = vst [vmem:[#allocation11] sm:$0xff] %v1310_v0 }
 0x1b2   :  { %1324 = dma.vmem_to_hbm [thread:$0]  %s1320_s29, 128, %s1322_s9, [#allocation4]  }
 0x1b6   :  { %v1311_v1 = vpop.f32.mrf.mxu3 }
 0x1b7   :  { %2218 = dma.done.wait [#allocation4], 128  }
 0x1b8   :  { %2219 = vsyncadd [#allocation4], 4294967168 }
 0x1b9   :  { %1329 = vsyncpa [#allocation3], 1 }
 0x1ba   :  { %1330 = vsyncpa [#allocation6], 1 }
 0x1bb   :  { %1331 = vsyncpa [#allocation9], 1 }
 0x1bc   :  { %1332 = vsyncpa [#allocation4], 1 }

</bundles_post_ra>
